<compile_context>
chip_gen: v5e
topology: v5e:2x2
jax: 0.10.0
libtpu: 0.0.40
codegen_flags: <defaults>
</compile_context>

<pallas_src>
import jax
import jax.numpy as jnp
from jax.experimental import pallas as pl
from jax.experimental.pallas import tpu as pltpu


def crop_center(matrix, target_size):
    """Same semantics as the PyTorch helper (2-D matrix, (H, W) target)."""
    center_x, center_y = matrix.shape[1] // 2, matrix.shape[0] // 2
    crop_x = center_x - target_size[1] // 2
    crop_y = center_y - target_size[0] // 2
    crop_x_end = crop_x + target_size[1]
    crop_y_end = crop_y + target_size[0]
    return matrix[crop_y:crop_y_end, crop_x:crop_x_end]


def _halftone_kernel(x_ref, thr_ref, o_ref):
    # x_ref:   (tm, tl) tile of the flattened encoded image (native dtype)
    # thr_ref: (1, tl)  pre-normalized f32 threshold row (broadcast over rows)
    # Upcast to f32 for the compare (no-op for f32; v5e's VPU has no bf16).
    x = x_ref[...].astype(jnp.float32)
    t = thr_ref[...]
    o_ref[...] = jnp.where(x >= t,
                           jnp.float32(1.0), jnp.float32(-1.0)).astype(o_ref.dtype)


def _per_buffer_budget_bytes():
    """Per-block VMEM budget. 2 MiB is safe everywhere (v5e default scoped
    VMEM is 16 MiB with 4 double-buffered buffers); bump to 4 MiB on v7x-class
    chips where HBM BW makes the fixed per-step overhead relatively large."""
    budget = 2 * 1024 * 1024
    try:
        info = pltpu.get_tpu_info()
        vmem = getattr(info, "vmem_capacity_bytes", None)
        if vmem is not None and vmem <= 64 * 1024 * 1024:   # v7x: 64 MiB / TC
            budget = 4 * 1024 * 1024
    except Exception:
        pass
    return budget


def _choose_tiles(R, L_pad, in_itemsize, out_itemsize, budget_bytes):
    """Pick (tm, tl): tm multiple of 8 (or == R), tl multiple of 128 (or == L_pad),
    keeping the largest per-block buffer under `budget_bytes`."""
    itemsize = max(in_itemsize, out_itemsize, 4)
    max_elems = max(budget_bytes // itemsize, 8 * 128)

    if L_pad * 8 <= max_elems:
        # Full rows fit: tile rows only.
        tl = L_pad
        tm = max_elems // L_pad
        if tm >= R:
            tm = R
        else:
            tm = max(8, (tm // 8) * 8)
    else:
        # A handful of rows is already big: tile the lane axis too.
        tm = 8 if R >= 8 else R
        tl = (max_elems // max(tm, 1) // 128) * 128
        tl = max(128, min(tl, L_pad))

    # Guarantee >= 2 blocks for non-trivial inputs so v7x's two TensorCores
    # both get work (single-block grids strand one core and lose DMA overlap).
    if (-(-R // tm)) * (-(-L_pad // tl)) == 1 and R >= 16:
        half = -(-R // 2)
        tm = max(8, ((half + 7) // 8) * 8)

    return tm, tl


def halftone_forward(encoded_image, halftone_matrix, out_dtype=None):
    """encoded_image: (B, C, H, W) float; halftone_matrix: (Hm, Wm) float."""
    B, C, H, W = encoded_image.shape

    # Keep the image in its native floating dtype (avoid an extra HBM pass).
    if not jnp.issubdtype(encoded_image.dtype, jnp.floating):
        encoded_image = encoded_image.astype(jnp.float32)
    in_dtype = encoded_image.dtype
    if out_dtype is None:
        out_dtype = in_dtype           # +/-1.0 is exactly representable

    # Cheap glue on the tiny screen matrix (constant-folds under jit):
    # Normalize([0.5],[0.5]):  (t - 0.5) / 0.5  ==  t * 2 - 1  (bit-identical in f32)
    cropped = crop_center(halftone_matrix, (H, W))
    thr = (cropped.astype(jnp.float32) * 2.0 - 1.0).reshape(1, H * W)

    # Lane-dense 2-D view: rows = (batch, channel), lanes = flattened (H, W).
    R = B * C
    L = H * W
    L_pad = ((L + 127) // 128) * 128
    x2d = encoded_image.reshape(R, L)
    if L_pad != L:
        # Keep stores unmasked even when H*W isn't a multiple of 128.
        x2d = jnp.pad(x2d, ((0, 0), (0, L_pad - L)))
        thr = jnp.pad(thr, ((0, 0), (0, L_pad - L)))

    budget = _per_buffer_budget_bytes()
    tm, tl = _choose_tiles(R, L_pad,
                           jnp.dtype(in_dtype).itemsize,
                           jnp.dtype(out_dtype).itemsize,
                           budget)
    grid = (pl.cdiv(R, tm), pl.cdiv(L_pad, tl))

    out2d = pl.pallas_call(
        _halftone_kernel,
        out_shape=jax.ShapeDtypeStruct((R, L_pad), out_dtype),
        grid_spec=pl.GridSpec(
            grid=grid,
            in_specs=[
                pl.BlockSpec((tm, tl), lambda i, j: (i, j)),   # image tile
                pl.BlockSpec((1, tl), lambda i, j: (0, j)),    # shared threshold
            ],
            out_specs=pl.BlockSpec((tm, tl), lambda i, j: (i, j)),
        ),
        compiler_params=pltpu.CompilerParams(
            dimension_semantics=("parallel", "parallel")),
        cost_estimate=pl.CostEstimate(
            flops=2 * R * L,            # compare + select
            transcendentals=0,
            bytes_accessed=R * L * (jnp.dtype(in_dtype).itemsize
                                    + jnp.dtype(out_dtype).itemsize) + L * 4),
    )(x2d, thr)

    if L_pad != L:
        out2d = out2d[:, :L]
    return out2d.reshape(B, C, H, W)


def reference_forward(encoded_image, halftone_matrix):
    """Pure-JAX reference of the PyTorch forward."""
    H, W = encoded_image.shape[2:4]
    cropped = crop_center(halftone_matrix, (H, W))
    thr = (cropped[None, None, :, :].astype(jnp.float32) - 0.5) / 0.5
    return jnp.where(encoded_image.astype(jnp.float32) >= thr,
                     1.0, -1.0).astype(jnp.float32)


if __name__ == "__main__":
    key = jax.random.PRNGKey(0)
    k_img, k_screen = jax.random.split(key)

    B, C, H, W = 2, 4, 16, 16
    # Encoded image roughly in [-1, 1], as produced upstream of this noise layer.
    encoded_image = jax.random.uniform(
        k_img, (B, C, H, W), dtype=jnp.float32, minval=-1.0, maxval=1.0)

    # Deterministic synthetic halftone screen matrix (stands in for screen_matrx.npy),
    # values in [0, 1], larger than the image so center-crop is meaningful.
    halftone_matrix = jax.random.uniform(
        k_screen, (64, 64), dtype=jnp.float32, minval=0.0, maxval=1.0)

    out = halftone_forward(encoded_image, halftone_matrix)
    out = jax.block_until_ready(out)

    ref = reference_forward(encoded_image, halftone_matrix)
    assert out.shape == (B, C, H, W)
    assert out.dtype == jnp.float32
    assert jnp.array_equal(out.astype(jnp.float32), ref), \
        "Pallas output mismatch vs reference"

    print("KERNEL_OK")
</pallas_src>

<mosaic_0001>
module attributes {stable_mosaic.version = 11 : i64} {
  func.func @_halftone_kernel(%arg0: i32, %arg1: i32, %arg2: memref<8x256xf32, #tpu.memory_space<vmem>>, %arg3: memref<1x256xf32, #tpu.memory_space<vmem>>, %arg4: memref<8x256xf32, #tpu.memory_space<vmem>>) attributes {dimension_semantics = [#tpu.dimension_semantics<parallel>, #tpu.dimension_semantics<parallel>], iteration_bounds = array<i64: 1, 1>, scalar_prefetch = 0 : i64, scratch_operands = 0 : i64, tpu.core_type = #tpu.core_type<tc>, window_params = [{transform_indices = @transform_0, window_bounds = array<i64: 8, 256>}, {transform_indices = @transform_1, window_bounds = array<i64: 1, 256>}, {transform_indices = @transform_2, window_bounds = array<i64: 8, 256>}]} {
    %c0 = arith.constant 0 : index
    %c0_0 = arith.constant 0 : index
    %0 = vector.load %arg2[%c0, %c0_0] : memref<8x256xf32, #tpu.memory_space<vmem>>, vector<8x256xf32>
    %c0_1 = arith.constant 0 : index
    %c0_2 = arith.constant 0 : index
    %1 = vector.load %arg3[%c0_1, %c0_2] : memref<1x256xf32, #tpu.memory_space<vmem>>, vector<1x256xf32>
    %2 = vector.broadcast %1 : vector<1x256xf32> to vector<8x256xf32>
    %3 = arith.cmpf oge, %0, %2 : vector<8x256xf32>
    %cst = arith.constant 1.000000e+00 : f32
    %cst_3 = arith.constant -1.000000e+00 : f32
    %4 = vector.broadcast %cst : f32 to vector<8x256xf32>
    %5 = vector.broadcast %cst_3 : f32 to vector<8x256xf32>
    %6 = arith.select %3, %4, %5 : vector<8x256xi1>, vector<8x256xf32>
    %c0_4 = arith.constant 0 : index
    %c0_5 = arith.constant 0 : index
    %7 = vector.load %arg4[%c0_4, %c0_5] : memref<8x256xf32, #tpu.memory_space<vmem>>, vector<8x256xf32>
    tpu.vector_store %arg4[%c0_4, %c0_5], %6 {strides = array<i32>} : memref<8x256xf32, #tpu.memory_space<vmem>>, vector<8x256xf32>,
    return
  }
  func.func @transform_0(%arg0: i32, %arg1: i32) -> (i32, i32) {
    %c0_i32 = arith.constant 0 : i32
    return %arg0, %arg1 : i32, i32
  }
  func.func @transform_1(%arg0: i32, %arg1: i32) -> (i32, i32) {
    %c0_i32 = arith.constant 0 : i32
    %c0_i32_0 = arith.constant 0 : i32
    return %c0_i32, %arg1 : i32, i32
  }
  func.func @transform_2(%arg0: i32, %arg1: i32) -> (i32, i32) {
    %c0_i32 = arith.constant 0 : i32
    return %arg0, %arg1 : i32, i32
  }
}

</mosaic_0001>

<bundles_post_ra>
// kernel: tpu_custom_call.1
= control target key start
LH: loop header
LB: loop body
LE: loop exit
PB: predicated region body
PF: predicated region fallthrough
CT: control target
= control target key end

     0   :  { %7 = vsyncpa [#allocation3], 0  ;;  %s182_s0 = inlined_call_operand.hbm [shape: f32[8,256], index: 0, kind: input, shape index: {}]   ;;  %s183_s1 = inlined_call_operand.hbm [shape: f32[1,256], index: 1, kind: input, shape index: {}]   ;;  %s184_s2 = inlined_call_operand.hbm [shape: f32[8,256], index: 2, kind: output, shape index: {}]  }
   0x1   :  { %8 = vsyncpa [#allocation6], 0 }
   0x2   :  { %9 = vsyncpa [#allocation4], 0  ;;  %s15_s11 = sshll.u32 %s182_s0, 4  ;;  %s154_s12 = smov [#allocation2]   ;;  %s16_s11 = int_to_ptr.hbm [resolvable:$true] %s15_s11 }
   0x3   :  { %s17_s13 = sshll.u32 %s154_s12, 4  ;;  %s26_s16 = sshll.u32 %s183_s1, 4  ;;  %s18_s13 = int_to_ptr.vmem [resolvable:$true] %s17_s13  ;;  %s27_s16 = int_to_ptr.hbm [resolvable:$true] %s26_s16 }
   0x4   :  { %20 = dma.hbm_to_vmem [thread:$0]  %s16_s11, 256, %s18_s13, [#allocation3]  }
   0x5   :  { %s155_s17 = smov [#allocation5]  }
   0x6   :  { %s28_s18 = sshll.u32 %s155_s17, 4  ;;  %s29_s18 = int_to_ptr.vmem [resolvable:$true] %s28_s18 }
   0x7   :  { %31 = dma.hbm_to_vmem [thread:$0]  %s27_s16, 32, %s29_s18, [#allocation6]  }
   0x8   :  { %148 = dma.done.wait [#allocation3], 256  }
   0x9   :  { %149 = vsyncadd [#allocation3], 4294967040 }
   0xa   :  { %150 = dma.done.wait [#allocation6], 32  }
   0xb   :  { %151 = vsyncadd [#allocation6], 4294967264  ;;  %v40_v0 = vld [vmem:[#allocation2] sm:$0xff]  ;;  %v42_v1 = vld [vmem:[#allocation5] sm:$0x3]  ;;  %s156_s0 = smov [#allocation7]  }
   0xc   :  { %v41_v2 = vld [vmem:[#allocation2 + $0x8] sm:$0xff]  ;;  %v44_v3 = vperm.slane %v42_v1, 0  ;;  %v45_v4 = vperm.slane %v42_v1, 1  ;;  %s59_s19 = sshll.u32 %s156_s0, 4  ;;  %s61_s1 = sshll.u32 %s184_s2, 4  ;;  %v157_v5 = vmov -1.0   ;;  %s60_s19 = int_to_ptr.vmem [resolvable:$true] %s59_s19  ;;  %s62_s1 = int_to_ptr.hbm [resolvable:$true] %s61_s1 }
   0xe   :  { %vm48_vm0 = vcmp.ge.f32.partialorder %v40_v0, %v44_v3  ;;  %vm49_vm1 = vcmp.ge.f32.partialorder %v41_v2, %v45_v4 }
   0xf   :  { %v50_v6 = vsel %vm48_vm0, 1.0, %v157_v5  ;;  %v51_v7 = vsel %vm49_vm1, 1.0, %v157_v5 }
  0x10   :  { %52 = vst [vmem:[#allocation7] sm:$0xff] %v50_v6 }
  0x11   :  { %53 = vst [vmem:[#allocation7 + $0x8] sm:$0xff] %v51_v7 }
  0x12   :  { %64 = dma.vmem_to_hbm [thread:$0]  %s60_s19, 256, %s62_s1, [#allocation4]  }
  0x13   :  { %152 = dma.done.wait [#allocation4], 256  }
  0x14   :  { %153 = vsyncadd [#allocation4], 4294967040 }
  0x15   :  { %69 = vsyncpa [#allocation3], 1 }
  0x16   :  { %70 = vsyncpa [#allocation6], 1 }
  0x17   :  { %71 = vsyncpa [#allocation4], 1 }

</bundles_post_ra>
